<compile_context>
chip_gen: v6e
topology: v6e:2x2x1
jax: 0.10.0
libtpu: 0.0.40
codegen_flags: <defaults>
</compile_context>

<pallas_src>
import functools

import jax
import jax.numpy as jnp
import numpy as np
from jax.experimental import pallas as pl
from jax.experimental.pallas import tpu as pltpu

BN_EPS = 1e-5
PU_EPS = 1e-7
LANE = 128


def _round_up(x, m):
    return (x + m - 1) // m * m


def _conv_im2col(src, w_cat, offsets, out_len):
    """3x3 'same' conv as a single im2col MXU matmul on a flat-spatial slab.

    src   : (Cin, L) value; lane axis = flattened padded image (+ apron).
    w_cat : (Cout, 9*Cin), tap-major column blocks matching `offsets`.
    Returns (Cout, out_len) f32; only interior columns are meaningful.
    """
    patches = jnp.concatenate([src[:, o:o + out_len] for o in offsets], axis=0)
    return jnp.dot(w_cat, patches, preferred_element_type=jnp.float32)


def _conv1_stats_kernel(x_ref, w1_ref, mask_ref, h1_ref, st_ref, *, offsets):
    out_len = h1_ref.shape[-1]
    h = _conv_im2col(x_ref[...], w1_ref[...], offsets, out_len)      # (C, Le)
    h1_ref[...] = h
    hm = h * mask_ref[...]                     # zero non-interior columns
    st_ref[:, 0:1] = jnp.sum(hm, axis=1, keepdims=True)              # (C, 1)
    st_ref[:, 1:2] = jnp.sum(hm * hm, axis=1, keepdims=True)         # (C, 1)


def _produnit_stats_kernel(h1_ref, w2_ref, scale_ref, shift_ref, minv_ref,
                           mask_e_ref, mask_s_ref, pu_ref, st_ref, *, offsets):
    out_len = pu_ref.shape[-1]
    h_bn = h1_ref[...] * scale_ref[...] + shift_ref[...]             # BN1 affine
    # clamp -> log; the mask zeroes exactly the positions that must act as the
    # product-unit conv's zero padding (and garbage border columns).
    log_x = mask_e_ref[...] * jnp.log(jnp.maximum(h_bn, minv_ref[...]))
    pu = jnp.exp(_conv_im2col(log_x, w2_ref[...], offsets, out_len))
    pu_ref[...] = pu
    pm = pu * mask_s_ref[...]
    st_ref[:, 0:1] = jnp.sum(pm, axis=1, keepdims=True)
    st_ref[:, 1:2] = jnp.sum(pm * pm, axis=1, keepdims=True)


def _bn_residual_kernel(pu_ref, x_ref, scale_ref, shift_ref, out_ref):
    out_ref[...] = pu_ref[...] * scale_ref[...] + shift_ref[...] + x_ref[...]


def product_unit_residual_block(x_nchw, params):
    """NCHW in / NCHW out; parameters in PyTorch layouts."""
    N, C, H, W = x_nchw.shape
    Hp, Wp = H + 2, W + 2
    P = Hp * Wp                        # flattened padded image length
    A = Wp + 1                         # flat offset of the 3x3 window centre
    Ls = _round_up(P, LANE)            # conv2 / output slab width
    Le = _round_up(Ls + 2 * A, LANE)   # conv1 output slab width
    Lx = _round_up(Le + 2 * A, LANE)   # padded-input slab width
    offsets = tuple(ky * Wp + kx for ky in range(3) for kx in range(3))
    count = float(N * H * W)

    x = x_nchw.astype(jnp.float32)
    xpad_flat = jnp.pad(x, ((0, 0), (0, 0), (1, 1), (1, 1))).reshape(N, C, P)
    x_e = jnp.pad(xpad_flat, ((0, 0), (0, 0), (2 * A, Lx - P - 2 * A)))
    x_s = jnp.pad(xpad_flat, ((0, 0), (0, 0), (0, Ls - P)))

    # 0/1 mask of interior (non-padding) positions in the flat layouts.
    m2d = np.zeros((Hp, Wp), np.float32)
    m2d[1:H + 1, 1:W + 1] = 1.0
    mflat = m2d.reshape(P)
    mask_e = jnp.asarray(np.pad(mflat, (A, Le - P - A))).reshape(1, Le)
    mask_s = jnp.asarray(np.pad(mflat, (0, Ls - P))).reshape(1, Ls)

    # OIHW -> (Cout, 9*Cin), tap-major column blocks matching `offsets`.
    def pack_w(w):
        return jnp.transpose(w, (0, 2, 3, 1)).reshape(C, 9 * C).astype(jnp.float32)

    w1cat = pack_w(params["w1"])
    w2cat = pack_w(params["w2"])
    min_val = (jax.nn.softplus(params["threshold"]) + PU_EPS
               ).reshape(1, 1).astype(jnp.float32)

    cp = pltpu.CompilerParams(
        dimension_semantics=("parallel",),          # 2nd TC on v7x
        vmem_limit_bytes=32 * 1024 * 1024)          # explicit, safe on all gens

    def resident(shape):
        return pl.BlockSpec(shape, lambda n, _d=len(shape): (0,) * _d)

    def per_n(shape):
        return pl.BlockSpec((None,) + shape,
                            lambda n, _d=len(shape): (n,) + (0,) * _d)

    # --- call A: conv1 + per-sample BN1 partial stats ----------------------
    h1, stats1 = pl.pallas_call(
        functools.partial(_conv1_stats_kernel, offsets=offsets),
        grid=(N,),
        in_specs=[per_n((C, Lx)), resident((C, 9 * C)), resident((1, Le))],
        out_specs=[per_n((C, Le)), per_n((C, 2))],
        out_shape=[jax.ShapeDtypeStruct((N, C, Le), jnp.float32),
                   jax.ShapeDtypeStruct((N, C, 2), jnp.float32)],
        compiler_params=cp,
    )(x_e, w1cat, mask_e)

    def bn_affine(stats, gamma, beta):
        tot = jnp.sum(stats, axis=0)                  # (C, 2)
        mean = tot[:, 0] / count
        var = tot[:, 1] / count - mean * mean         # biased (train-mode) var
        scale = gamma.astype(jnp.float32) * jax.lax.rsqrt(var + BN_EPS)
        shift = beta.astype(jnp.float32) - mean * scale
        return scale.reshape(C, 1), shift.reshape(C, 1)

    scale1, shift1 = bn_affine(stats1, params["gamma1"], params["beta1"])

    # --- call B: BN1 affine + product-unit conv + BN2 partial stats --------
    pu, stats2 = pl.pallas_call(
        functools.partial(_produnit_stats_kernel, offsets=offsets),
        grid=(N,),
        in_specs=[per_n((C, Le)), resident((C, 9 * C)), resident((C, 1)),
                  resident((C, 1)), resident((1, 1)), resident((1, Le)),
                  resident((1, Ls))],
        out_specs=[per_n((C, Ls)), per_n((C, 2))],
        out_shape=[jax.ShapeDtypeStruct((N, C, Ls), jnp.float32),
                   jax.ShapeDtypeStruct((N, C, 2), jnp.float32)],
        compiler_params=cp,
    )(h1, w2cat, scale1, shift1, min_val, mask_e, mask_s)

    scale2, shift2 = bn_affine(stats2, params["gamma2"], params["beta2"])

    # --- call C: BN2 affine + residual add ----------------------------------
    out_s = pl.pallas_call(
        _bn_residual_kernel,
        grid=(N,),
        in_specs=[per_n((C, Ls)), per_n((C, Ls)), resident((C, 1)),
                  resident((C, 1))],
        out_specs=per_n((C, Ls)),
        out_shape=jax.ShapeDtypeStruct((N, C, Ls), jnp.float32),
        compiler_params=cp,
    )(pu, x_s, scale2, shift2)

    # drop the slab padding / image border -> NCHW directly (no transpose).
    return out_s[:, :, :P].reshape(N, C, Hp, Wp)[:, :, 1:H + 1, 1:W + 1]


def init_params(key, channels):
    """Deterministic synthetic params matching the PyTorch module's shapes."""
    k1, k2 = jax.random.split(key)
    fan_in = channels * 3 * 3
    # conv1: mimic nn.Conv2d default init (kaiming_uniform, a=sqrt(5))
    bnd1 = float(np.sqrt(6.0 / ((1.0 + 5.0) * fan_in)))
    w1 = jax.random.uniform(k1, (channels, channels, 3, 3), jnp.float32,
                            -bnd1, bnd1)
    # product unit: kaiming_uniform with a=5.0
    bnd2 = float(np.sqrt(6.0 / ((1.0 + 25.0) * fan_in)))
    w2 = jax.random.uniform(k2, (channels, channels, 3, 3), jnp.float32,
                            -bnd2, bnd2)
    return {
        "w1": w1,
        "w2": w2,
        "threshold": jnp.zeros((1,), jnp.float32),
        "gamma1": jnp.ones((channels,), jnp.float32),
        "beta1": jnp.zeros((channels,), jnp.float32),
        "gamma2": jnp.ones((channels,), jnp.float32),
        "beta2": jnp.zeros((channels,), jnp.float32),
    }


def _reference(x_nchw, params):
    """Plain-JAX reference of the PyTorch forward (for a sanity check)."""
    def conv(x, w):
        return jax.lax.conv_general_dilated(
            x, w, (1, 1), [(1, 1), (1, 1)],
            dimension_numbers=("NCHW", "OIHW", "NCHW"),
            precision=jax.lax.Precision.HIGHEST)

    def bn(x, g, b):
        mean = x.mean(axis=(0, 2, 3), keepdims=True)
        var = ((x - mean) ** 2).mean(axis=(0, 2, 3), keepdims=True)
        return ((x - mean) * jax.lax.rsqrt(var + BN_EPS)
                * g.reshape(1, -1, 1, 1) + b.reshape(1, -1, 1, 1))

    min_val = jax.nn.softplus(params["threshold"])[0] + PU_EPS
    out = conv(x_nchw, params["w1"])
    out = bn(out, params["gamma1"], params["beta1"])
    out = jnp.exp(conv(jnp.log(jnp.maximum(out, min_val)), params["w2"]))
    out = bn(out, params["gamma2"], params["beta2"])
    return out + x_nchw


if __name__ == "__main__":
    N, C, H, W = 2, 8, 16, 16           # in_channels == out_channels, stride=1
    key = jax.random.PRNGKey(0)
    k_x, k_p = jax.random.split(key)
    x = jax.random.normal(k_x, (N, C, H, W), jnp.float32)
    params = init_params(k_p, C)

    fwd = jax.jit(product_unit_residual_block)
    out = jax.block_until_ready(fwd(x, params))

    ref = jax.block_until_ready(_reference(x, params))
    np.testing.assert_allclose(np.asarray(out), np.asarray(ref),
                               rtol=1e-2, atol=1e-2)
    print("KERNEL_OK")
</pallas_src>

<mosaic_0001>
module attributes {stable_mosaic.version = 11 : i64} {
  func.func @_conv1_stats_kernel(%arg0: i32, %arg1: memref<1x8x640xf32, #tpu.memory_space<vmem>>, %arg2: memref<8x72xf32, #tpu.memory_space<vmem>>, %arg3: memref<1x512xf32, #tpu.memory_space<vmem>>, %arg4: memref<1x8x512xf32, #tpu.memory_space<vmem>>, %arg5: memref<1x8x2xf32, #tpu.memory_space<vmem>>) attributes {dimension_semantics = [#tpu.dimension_semantics<parallel>], iteration_bounds = array<i64: 2>, scalar_prefetch = 0 : i64, scratch_operands = 0 : i64, tpu.core_type = #tpu.core_type<tc>, window_params = [{transform_indices = @transform_0, window_bounds = array<i64: 1, 8, 640>}, {pipeline_mode = #tpu.pipeline_mode<synchronous>, transform_indices = @transform_1, window_bounds = array<i64: 8, 72>}, {pipeline_mode = #tpu.pipeline_mode<synchronous>, transform_indices = @transform_2, window_bounds = array<i64: 1, 512>}, {transform_indices = @transform_3, window_bounds = array<i64: 1, 8, 512>}, {transform_indices = @transform_4, window_bounds = array<i64: 1, 8, 2>}]} {
    %c0 = arith.constant 0 : index
    %c0_0 = arith.constant 0 : index
    %c0_1 = arith.constant 0 : index
    %0 = vector.load %arg1[%c0, %c0_0, %c0_1] : memref<1x8x640xf32, #tpu.memory_space<vmem>>, vector<1x8x640xf32>
    %1 = vector.shape_cast %0 : vector<1x8x640xf32> to vector<8x640xf32>
    %c0_2 = arith.constant 0 : index
    %c0_3 = arith.constant 0 : index
    %2 = vector.load %arg2[%c0_2, %c0_3] : memref<8x72xf32, #tpu.memory_space<vmem>>, vector<8x72xf32>
    %3 = vector.extract_strided_slice %1 {offsets = [0, 0], sizes = [8, 512], strides = [1, 1]} : vector<8x640xf32> to vector<8x512xf32>
    %4 = vector.extract_strided_slice %1 {offsets = [0, 1], sizes = [8, 512], strides = [1, 1]} : vector<8x640xf32> to vector<8x512xf32>
    %5 = vector.extract_strided_slice %1 {offsets = [0, 2], sizes = [8, 512], strides = [1, 1]} : vector<8x640xf32> to vector<8x512xf32>
    %6 = vector.extract_strided_slice %1 {offsets = [0, 18], sizes = [8, 512], strides = [1, 1]} : vector<8x640xf32> to vector<8x512xf32>
    %7 = vector.extract_strided_slice %1 {offsets = [0, 19], sizes = [8, 512], strides = [1, 1]} : vector<8x640xf32> to vector<8x512xf32>
    %8 = vector.extract_strided_slice %1 {offsets = [0, 20], sizes = [8, 512], strides = [1, 1]} : vector<8x640xf32> to vector<8x512xf32>
    %9 = vector.extract_strided_slice %1 {offsets = [0, 36], sizes = [8, 512], strides = [1, 1]} : vector<8x640xf32> to vector<8x512xf32>
    %10 = vector.extract_strided_slice %1 {offsets = [0, 37], sizes = [8, 512], strides = [1, 1]} : vector<8x640xf32> to vector<8x512xf32>
    %11 = vector.extract_strided_slice %1 {offsets = [0, 38], sizes = [8, 512], strides = [1, 1]} : vector<8x640xf32> to vector<8x512xf32>
    %12 = tpu.concatenate %3, %4, %5, %6, %7, %8, %9, %10, %11 in 0 : vector<8x512xf32>, vector<8x512xf32>, vector<8x512xf32>, vector<8x512xf32>, vector<8x512xf32>, vector<8x512xf32>, vector<8x512xf32>, vector<8x512xf32>, vector<8x512xf32> -> vector<72x512xf32>
    %cst = arith.constant dense<0.000000e+00> : vector<8x512xf32>
    %13 = tpu.matmul %2, %12, %cst {dimension_numbers = #tpu.dot_dimension_numbers<[1], [0], [0], [1], [0, 0, 1, 1], [], []>} : vector<8x72xf32>, vector<72x512xf32>, vector<8x512xf32> -> vector<8x512xf32>
    %c0_4 = arith.constant 0 : index
    %c0_5 = arith.constant 0 : index
    %c0_6 = arith.constant 0 : index
    %14 = vector.load %arg4[%c0_4, %c0_5, %c0_6] : memref<1x8x512xf32, #tpu.memory_space<vmem>>, vector<1x8x512xf32>
    %15 = vector.shape_cast %14 : vector<1x8x512xf32> to vector<8x512xf32>
    %16 = vector.shape_cast %13 : vector<8x512xf32> to vector<1x8x512xf32>
    tpu.vector_store %arg4[%c0_4, %c0_5, %c0_6], %16 {strides = array<i32>} : memref<1x8x512xf32, #tpu.memory_space<vmem>>, vector<1x8x512xf32>,
    %c0_7 = arith.constant 0 : index
    %c0_8 = arith.constant 0 : index
    %17 = vector.load %arg3[%c0_7, %c0_8] : memref<1x512xf32, #tpu.memory_space<vmem>>, vector<1x512xf32>
    %18 = vector.broadcast %17 : vector<1x512xf32> to vector<8x512xf32>
    %19 = arith.mulf %13, %18 : vector<8x512xf32>
    %cst_9 = arith.constant dense<0.000000e+00> : vector<8xf32>
    %20 = vector.multi_reduction <add>, %19, %cst_9 [1] : vector<8x512xf32> to vector<8xf32>
    %21 = vector.shape_cast %20 : vector<8xf32> to vector<8x1xf32>
    %c0_10 = arith.constant 0 : index
    %c0_11 = arith.constant 0 : index
    %c0_12 = arith.constant 0 : index
    %22 = vector.load %arg5[%c0_10, %c0_11, %c0_12] : memref<1x8x2xf32, #tpu.memory_space<vmem>>, vector<1x8x1xf32>
    %23 = vector.shape_cast %22 : vector<1x8x1xf32> to vector<8x1xf32>
    %24 = vector.shape_cast %21 : vector<8x1xf32> to vector<1x8x1xf32>
    tpu.vector_store %arg5[%c0_10, %c0_11, %c0_12], %24 {strides = array<i32>} : memref<1x8x2xf32, #tpu.memory_space<vmem>>, vector<1x8x1xf32>,
    %25 = arith.mulf %19, %19 : vector<8x512xf32>
    %cst_13 = arith.constant dense<0.000000e+00> : vector<8xf32>
    %26 = vector.multi_reduction <add>, %25, %cst_13 [1] : vector<8x512xf32> to vector<8xf32>
    %27 = vector.shape_cast %26 : vector<8xf32> to vector<8x1xf32>
    %c0_14 = arith.constant 0 : index
    %c0_15 = arith.constant 0 : index
    %c1 = arith.constant 1 : index
    %28 = vector.load %arg5[%c0_14, %c0_15, %c1] : memref<1x8x2xf32, #tpu.memory_space<vmem>>, vector<1x8x1xf32>
    %29 = vector.shape_cast %28 : vector<1x8x1xf32> to vector<8x1xf32>
    %30 = vector.shape_cast %27 : vector<8x1xf32> to vector<1x8x1xf32>
    tpu.vector_store %arg5[%c0_14, %c0_15, %c1], %30 {strides = array<i32>} : memref<1x8x2xf32, #tpu.memory_space<vmem>>, vector<1x8x1xf32>,
    return
  }
  func.func @transform_0(%arg0: i32) -> (i32, i32, i32) {
    %c0_i32 = arith.constant 0 : i32
    %c0_i32_0 = arith.constant 0 : i32
    %c0_i32_1 = arith.constant 0 : i32
    return %arg0, %c0_i32, %c0_i32_0 : i32, i32, i32
  }
  func.func @transform_1(%arg0: i32) -> (i32, i32) {
    %c0_i32 = arith.constant 0 : i32
    %c0_i32_0 = arith.constant 0 : i32
    %c0_i32_1 = arith.constant 0 : i32
    return %c0_i32, %c0_i32_0 : i32, i32
  }
  func.func @transform_2(%arg0: i32) -> (i32, i32) {
    %c0_i32 = arith.constant 0 : i32
    %c0_i32_0 = arith.constant 0 : i32
    %c0_i32_1 = arith.constant 0 : i32
    return %c0_i32, %c0_i32_0 : i32, i32
  }
  func.func @transform_3(%arg0: i32) -> (i32, i32, i32) {
    %c0_i32 = arith.constant 0 : i32
    %c0_i32_0 = arith.constant 0 : i32
    %c0_i32_1 = arith.constant 0 : i32
    return %arg0, %c0_i32, %c0_i32_0 : i32, i32, i32
  }
  func.func @transform_4(%arg0: i32) -> (i32, i32, i32) {
    %c0_i32 = arith.constant 0 : i32
    %c0_i32_0 = arith.constant 0 : i32
    %c0_i32_1 = arith.constant 0 : i32
    return %arg0, %c0_i32, %c0_i32_0 : i32, i32, i32
  }
}

module attributes {stable_mosaic.version = 11 : i64} {
  func.func @_bn_residual_kernel(%arg0: i32, %arg1: memref<1x8x384xf32, #tpu.memory_space<vmem>>, %arg2: memref<1x8x384xf32, #tpu.memory_space<vmem>>, %arg3: memref<8x1xf32, #tpu.memory_space<vmem>>, %arg4: memref<8x1xf32, #tpu.memory_space<vmem>>, %arg5: memref<1x8x384xf32, #tpu.memory_space<vmem>>) attributes {dimension_semantics = [#tpu.dimension_semantics<parallel>], iteration_bounds = array<i64: 2>, scalar_prefetch = 0 : i64, scratch_operands = 0 : i64, tpu.core_type = #tpu.core_type<tc>, window_params = [{transform_indices = @transform_0, window_bounds = array<i64: 1, 8, 384>}, {transform_indices = @transform_1, window_bounds = array<i64: 1, 8, 384>}, {pipeline_mode = #tpu.pipeline_mode<synchronous>, transform_indices = @transform_2, window_bounds = array<i64: 8, 1>}, {pipeline_mode = #tpu.pipeline_mode<synchronous>, transform_indices = @transform_3, window_bounds = array<i64: 8, 1>}, {transform_indices = @transform_4, window_bounds = array<i64: 1, 8, 384>}]} {
    %c0 = arith.constant 0 : index
    %c0_0 = arith.constant 0 : index
    %c0_1 = arith.constant 0 : index
    %0 = vector.load %arg1[%c0, %c0_0, %c0_1] : memref<1x8x384xf32, #tpu.memory_space<vmem>>, vector<1x8x384xf32>
    %1 = vector.shape_cast %0 : vector<1x8x384xf32> to vector<8x384xf32>
    %c0_2 = arith.constant 0 : index
    %c0_3 = arith.constant 0 : index
    %2 = vector.load %arg3[%c0_2, %c0_3] : memref<8x1xf32, #tpu.memory_space<vmem>>, vector<8x1xf32>
    %3 = vector.broadcast %2 : vector<8x1xf32> to vector<8x384xf32>
    %4 = arith.mulf %1, %3 : vector<8x384xf32>
    %c0_4 = arith.constant 0 : index
    %c0_5 = arith.constant 0 : index
    %5 = vector.load %arg4[%c0_4, %c0_5] : memref<8x1xf32, #tpu.memory_space<vmem>>, vector<8x1xf32>
    %6 = vector.broadcast %5 : vector<8x1xf32> to vector<8x384xf32>
    %7 = arith.addf %4, %6 : vector<8x384xf32>
    %c0_6 = arith.constant 0 : index
    %c0_7 = arith.constant 0 : index
    %c0_8 = arith.constant 0 : index
    %8 = vector.load %arg2[%c0_6, %c0_7, %c0_8] : memref<1x8x384xf32, #tpu.memory_space<vmem>>, vector<1x8x384xf32>
    %9 = vector.shape_cast %8 : vector<1x8x384xf32> to vector<8x384xf32>
    %10 = arith.addf %7, %9 : vector<8x384xf32>
    %c0_9 = arith.constant 0 : index
    %c0_10 = arith.constant 0 : index
    %c0_11 = arith.constant 0 : index
    %11 = vector.load %arg5[%c0_9, %c0_10, %c0_11] : memref<1x8x384xf32, #tpu.memory_space<vmem>>, vector<1x8x384xf32>
    %12 = vector.shape_cast %11 : vector<1x8x384xf32> to vector<8x384xf32>
    %13 = vector.shape_cast %10 : vector<8x384xf32> to vector<1x8x384xf32>
    tpu.vector_store %arg5[%c0_9, %c0_10, %c0_11], %13 {strides = array<i32>} : memref<1x8x384xf32, #tpu.memory_space<vmem>>, vector<1x8x384xf32>,
    return
  }
  func.func @transform_0(%arg0: i32) -> (i32, i32, i32) {
    %c0_i32 = arith.constant 0 : i32
    %c0_i32_0 = arith.constant 0 : i32
    %c0_i32_1 = arith.constant 0 : i32
    return %arg0, %c0_i32, %c0_i32_0 : i32, i32, i32
  }
  func.func @transform_1(%arg0: i32) -> (i32, i32, i32) {
    %c0_i32 = arith.constant 0 : i32
    %c0_i32_0 = arith.constant 0 : i32
    %c0_i32_1 = arith.constant 0 : i32
    return %arg0, %c0_i32, %c0_i32_0 : i32, i32, i32
  }
  func.func @transform_2(%arg0: i32) -> (i32, i32) {
    %c0_i32 = arith.constant 0 : i32
    %c0_i32_0 = arith.constant 0 : i32
    %c0_i32_1 = arith.constant 0 : i32
    return %c0_i32, %c0_i32_0 : i32, i32
  }
  func.func @transform_3(%arg0: i32) -> (i32, i32) {
    %c0_i32 = arith.constant 0 : i32
    %c0_i32_0 = arith.constant 0 : i32
    %c0_i32_1 = arith.constant 0 : i32
    return %c0_i32, %c0_i32_0 : i32, i32
  }
  func.func @transform_4(%arg0: i32) -> (i32, i32, i32) {
    %c0_i32 = arith.constant 0 : i32
    %c0_i32_0 = arith.constant 0 : i32
    %c0_i32_1 = arith.constant 0 : i32
    return %arg0, %c0_i32, %c0_i32_0 : i32, i32, i32
  }
}

module attributes {stable_mosaic.version = 11 : i64} {
  func.func @_produnit_stats_kernel(%arg0: i32, %arg1: memref<1x8x512xf32, #tpu.memory_space<vmem>>, %arg2: memref<8x72xf32, #tpu.memory_space<vmem>>, %arg3: memref<8x1xf32, #tpu.memory_space<vmem>>, %arg4: memref<8x1xf32, #tpu.memory_space<vmem>>, %arg5: memref<1x1xf32, #tpu.memory_space<vmem>>, %arg6: memref<1x512xf32, #tpu.memory_space<vmem>>, %arg7: memref<1x384xf32, #tpu.memory_space<vmem>>, %arg8: memref<1x8x384xf32, #tpu.memory_space<vmem>>, %arg9: memref<1x8x2xf32, #tpu.memory_space<vmem>>) attributes {dimension_semantics = [#tpu.dimension_semantics<parallel>], iteration_bounds = array<i64: 2>, scalar_prefetch = 0 : i64, scratch_operands = 0 : i64, tpu.core_type = #tpu.core_type<tc>, window_params = [{transform_indices = @transform_0, window_bounds = array<i64: 1, 8, 512>}, {pipeline_mode = #tpu.pipeline_mode<synchronous>, transform_indices = @transform_1, window_bounds = array<i64: 8, 72>}, {pipeline_mode = #tpu.pipeline_mode<synchronous>, transform_indices = @transform_2, window_bounds = array<i64: 8, 1>}, {pipeline_mode = #tpu.pipeline_mode<synchronous>, transform_indices = @transform_3, window_bounds = array<i64: 8, 1>}, {pipeline_mode = #tpu.pipeline_mode<synchronous>, transform_indices = @transform_4, window_bounds = array<i64: 1, 1>}, {pipeline_mode = #tpu.pipeline_mode<synchronous>, transform_indices = @transform_5, window_bounds = array<i64: 1, 512>}, {pipeline_mode = #tpu.pipeline_mode<synchronous>, transform_indices = @transform_6, window_bounds = array<i64: 1, 384>}, {transform_indices = @transform_7, window_bounds = array<i64: 1, 8, 384>}, {transform_indices = @transform_8, window_bounds = array<i64: 1, 8, 2>}]} {
    %c0 = arith.constant 0 : index
    %c0_0 = arith.constant 0 : index
    %c0_1 = arith.constant 0 : index
    %0 = vector.load %arg1[%c0, %c0_0, %c0_1] : memref<1x8x512xf32, #tpu.memory_space<vmem>>, vector<1x8x512xf32>
    %1 = vector.shape_cast %0 : vector<1x8x512xf32> to vector<8x512xf32>
    %c0_2 = arith.constant 0 : index
    %c0_3 = arith.constant 0 : index
    %2 = vector.load %arg3[%c0_2, %c0_3] : memref<8x1xf32, #tpu.memory_space<vmem>>, vector<8x1xf32>
    %3 = vector.broadcast %2 : vector<8x1xf32> to vector<8x512xf32>
    %4 = arith.mulf %1, %3 : vector<8x512xf32>
    %c0_4 = arith.constant 0 : index
    %c0_5 = arith.constant 0 : index
    %5 = vector.load %arg4[%c0_4, %c0_5] : memref<8x1xf32, #tpu.memory_space<vmem>>, vector<8x1xf32>
    %6 = vector.broadcast %5 : vector<8x1xf32> to vector<8x512xf32>
    %7 = arith.addf %4, %6 : vector<8x512xf32>
    %c0_6 = arith.constant 0 : index
    %c0_7 = arith.constant 0 : index
    %8 = vector.load %arg6[%c0_6, %c0_7] : memref<1x512xf32, #tpu.memory_space<vmem>>, vector<1x512xf32>
    %c0_8 = arith.constant 0 : index
    %c0_9 = arith.constant 0 : index
    %9 = vector.load %arg5[%c0_8, %c0_9] : memref<1x1xf32, #tpu.memory_space<vmem>>, vector<1x1xf32>
    %10 = vector.broadcast %9 : vector<1x1xf32> to vector<8x512xf32>
    %11 = arith.maximumf %7, %10 : vector<8x512xf32>
    %12 = math.log %11 : vector<8x512xf32>
    %13 = vector.broadcast %8 : vector<1x512xf32> to vector<8x512xf32>
    %14 = arith.mulf %13, %12 : vector<8x512xf32>
    %c0_10 = arith.constant 0 : index
    %c0_11 = arith.constant 0 : index
    %15 = vector.load %arg2[%c0_10, %c0_11] : memref<8x72xf32, #tpu.memory_space<vmem>>, vector<8x72xf32>
    %16 = vector.extract_strided_slice %14 {offsets = [0, 0], sizes = [8, 384], strides = [1, 1]} : vector<8x512xf32> to vector<8x384xf32>
    %17 = vector.extract_strided_slice %14 {offsets = [0, 1], sizes = [8, 384], strides = [1, 1]} : vector<8x512xf32> to vector<8x384xf32>
    %18 = vector.extract_strided_slice %14 {offsets = [0, 2], sizes = [8, 384], strides = [1, 1]} : vector<8x512xf32> to vector<8x384xf32>
    %19 = vector.extract_strided_slice %14 {offsets = [0, 18], sizes = [8, 384], strides = [1, 1]} : vector<8x512xf32> to vector<8x384xf32>
    %20 = vector.extract_strided_slice %14 {offsets = [0, 19], sizes = [8, 384], strides = [1, 1]} : vector<8x512xf32> to vector<8x384xf32>
    %21 = vector.extract_strided_slice %14 {offsets = [0, 20], sizes = [8, 384], strides = [1, 1]} : vector<8x512xf32> to vector<8x384xf32>
    %22 = vector.extract_strided_slice %14 {offsets = [0, 36], sizes = [8, 384], strides = [1, 1]} : vector<8x512xf32> to vector<8x384xf32>
    %23 = vector.extract_strided_slice %14 {offsets = [0, 37], sizes = [8, 384], strides = [1, 1]} : vector<8x512xf32> to vector<8x384xf32>
    %24 = vector.extract_strided_slice %14 {offsets = [0, 38], sizes = [8, 384], strides = [1, 1]} : vector<8x512xf32> to vector<8x384xf32>
    %25 = tpu.concatenate %16, %17, %18, %19, %20, %21, %22, %23, %24 in 0 : vector<8x384xf32>, vector<8x384xf32>, vector<8x384xf32>, vector<8x384xf32>, vector<8x384xf32>, vector<8x384xf32>, vector<8x384xf32>, vector<8x384xf32>, vector<8x384xf32> -> vector<72x384xf32>
    %cst = arith.constant dense<0.000000e+00> : vector<8x384xf32>
    %26 = tpu.matmul %15, %25, %cst {dimension_numbers = #tpu.dot_dimension_numbers<[1], [0], [0], [1], [0, 0, 1, 1], [], []>} : vector<8x72xf32>, vector<72x384xf32>, vector<8x384xf32> -> vector<8x384xf32>
    %27 = math.exp %26 : vector<8x384xf32>
    %c0_12 = arith.constant 0 : index
    %c0_13 = arith.constant 0 : index
    %c0_14 = arith.constant 0 : index
    %28 = vector.load %arg8[%c0_12, %c0_13, %c0_14] : memref<1x8x384xf32, #tpu.memory_space<vmem>>, vector<1x8x384xf32>
    %29 = vector.shape_cast %28 : vector<1x8x384xf32> to vector<8x384xf32>
    %30 = vector.shape_cast %27 : vector<8x384xf32> to vector<1x8x384xf32>
    tpu.vector_store %arg8[%c0_12, %c0_13, %c0_14], %30 {strides = array<i32>} : memref<1x8x384xf32, #tpu.memory_space<vmem>>, vector<1x8x384xf32>,
    %c0_15 = arith.constant 0 : index
    %c0_16 = arith.constant 0 : index
    %31 = vector.load %arg7[%c0_15, %c0_16] : memref<1x384xf32, #tpu.memory_space<vmem>>, vector<1x384xf32>
    %32 = vector.broadcast %31 : vector<1x384xf32> to vector<8x384xf32>
    %33 = arith.mulf %27, %32 : vector<8x384xf32>
    %cst_17 = arith.constant dense<0.000000e+00> : vector<8xf32>
    %34 = vector.multi_reduction <add>, %33, %cst_17 [1] : vector<8x384xf32> to vector<8xf32>
    %35 = vector.shape_cast %34 : vector<8xf32> to vector<8x1xf32>
    %c0_18 = arith.constant 0 : index
    %c0_19 = arith.constant 0 : index
    %c0_20 = arith.constant 0 : index
    %36 = vector.load %arg9[%c0_18, %c0_19, %c0_20] : memref<1x8x2xf32, #tpu.memory_space<vmem>>, vector<1x8x1xf32>
    %37 = vector.shape_cast %36 : vector<1x8x1xf32> to vector<8x1xf32>
    %38 = vector.shape_cast %35 : vector<8x1xf32> to vector<1x8x1xf32>
    tpu.vector_store %arg9[%c0_18, %c0_19, %c0_20], %38 {strides = array<i32>} : memref<1x8x2xf32, #tpu.memory_space<vmem>>, vector<1x8x1xf32>,
    %39 = arith.mulf %33, %33 : vector<8x384xf32>
    %cst_21 = arith.constant dense<0.000000e+00> : vector<8xf32>
    %40 = vector.multi_reduction <add>, %39, %cst_21 [1] : vector<8x384xf32> to vector<8xf32>
    %41 = vector.shape_cast %40 : vector<8xf32> to vector<8x1xf32>
    %c0_22 = arith.constant 0 : index
    %c0_23 = arith.constant 0 : index
    %c1 = arith.constant 1 : index
    %42 = vector.load %arg9[%c0_22, %c0_23, %c1] : memref<1x8x2xf32, #tpu.memory_space<vmem>>, vector<1x8x1xf32>
    %43 = vector.shape_cast %42 : vector<1x8x1xf32> to vector<8x1xf32>
    %44 = vector.shape_cast %41 : vector<8x1xf32> to vector<1x8x1xf32>
    tpu.vector_store %arg9[%c0_22, %c0_23, %c1], %44 {strides = array<i32>} : memref<1x8x2xf32, #tpu.memory_space<vmem>>, vector<1x8x1xf32>,
    return
  }
  func.func @transform_0(%arg0: i32) -> (i32, i32, i32) {
    %c0_i32 = arith.constant 0 : i32
    %c0_i32_0 = arith.constant 0 : i32
    %c0_i32_1 = arith.constant 0 : i32
    return %arg0, %c0_i32, %c0_i32_0 : i32, i32, i32
  }
  func.func @transform_1(%arg0: i32) -> (i32, i32) {
    %c0_i32 = arith.constant 0 : i32
    %c0_i32_0 = arith.constant 0 : i32
    %c0_i32_1 = arith.constant 0 : i32
    return %c0_i32, %c0_i32_0 : i32, i32
  }
  func.func @transform_2(%arg0: i32) -> (i32, i32) {
    %c0_i32 = arith.constant 0 : i32
    %c0_i32_0 = arith.constant 0 : i32
    %c0_i32_1 = arith.constant 0 : i32
    return %c0_i32, %c0_i32_0 : i32, i32
  }
  func.func @transform_3(%arg0: i32) -> (i32, i32) {
    %c0_i32 = arith.constant 0 : i32
    %c0_i32_0 = arith.constant 0 : i32
    %c0_i32_1 = arith.constant 0 : i32
    return %c0_i32, %c0_i32_0 : i32, i32
  }
  func.func @transform_4(%arg0: i32) -> (i32, i32) {
    %c0_i32 = arith.constant 0 : i32
    %c0_i32_0 = arith.constant 0 : i32
    %c0_i32_1 = arith.constant 0 : i32
    return %c0_i32, %c0_i32_0 : i32, i32
  }
  func.func @transform_5(%arg0: i32) -> (i32, i32) {
    %c0_i32 = arith.constant 0 : i32
    %c0_i32_0 = arith.constant 0 : i32
    %c0_i32_1 = arith.constant 0 : i32
    return %c0_i32, %c0_i32_0 : i32, i32
  }
  func.func @transform_6(%arg0: i32) -> (i32, i32) {
    %c0_i32 = arith.constant 0 : i32
    %c0_i32_0 = arith.constant 0 : i32
    %c0_i32_1 = arith.constant 0 : i32
    return %c0_i32, %c0_i32_0 : i32, i32
  }
  func.func @transform_7(%arg0: i32) -> (i32, i32, i32) {
    %c0_i32 = arith.constant 0 : i32
    %c0_i32_0 = arith.constant 0 : i32
    %c0_i32_1 = arith.constant 0 : i32
    return %arg0, %c0_i32, %c0_i32_0 : i32, i32, i32
  }
  func.func @transform_8(%arg0: i32) -> (i32, i32, i32) {
    %c0_i32 = arith.constant 0 : i32
    %c0_i32_0 = arith.constant 0 : i32
    %c0_i32_1 = arith.constant 0 : i32
    return %arg0, %c0_i32, %c0_i32_0 : i32, i32, i32
  }
}

</mosaic_0001>

<bundles_post_ra>
// kernel: product_unit_residual_block.5
= control target key start
LH: loop header
LB: loop body
LE: loop exit
PB: predicated region body
PF: predicated region fallthrough
CT: control target
= control target key end

     0   :  { %s370_s15 = smov 0   ;;  %s396_s0 = inlined_call_operand.vmem [shape: f32[2,8,384], index: 0, kind: input, shape index: {}]   ;;  %s397_s1 = inlined_call_operand.vmem [shape: f32[2,8,384], index: 1, kind: input, shape index: {}]   ;;  %s398_s2 = inlined_call_operand.vmem [shape: f32[8,1], index: 2, kind: input, shape index: {}]   ;;  %s399_s3 = inlined_call_operand.vmem [shape: f32[8,1], index: 3, kind: input, shape index: {}]   ;;  %s400_s4 = inlined_call_operand.vmem [shape: f32[2,8,384], index: 4, kind: output, shape index: {}]  }
   0x1 LB: > { %s315_s16 = sadd.s32 4294967295, %s342_s15   ;;  %p319_p0 = scmp.ge.s32.totalorder %s342_s15, 1  ;;  %s342_s15 = sphi %s370_s15, %s14_s15  }
   0x2   : > { %p172_p1 = scmp.lt.s32.totalorder %s342_s15, 3 }
   0x4   : > { %p173_p2 = pnand %p319_p0, %p172_p1 }
   0x5   : > { %p203_p3 = scmp.lt.s32.totalorder (!%p173_p2), %s315_s16, 1 }
   0x6   : > { %176 = sbr.rel (%p173_p2) target bundleno = 147 (0x93), region = 36 }
   0xb   : > { %v221_v0 = vld [vmem:[%s398_s2] sm:$0xff]  ;;  %v344_v1 = vmov 0   ;;  %s402_s16 = smov (!%p203_p3, %s315_s16), 1 }
   0xc   : > { %335 = vset.pattern.permute.xlu0 %v344_v1  ;;  %v230_v2 = vld [vmem:[%s399_s3] sm:$0xff]  ;;  %s325_s21 = smul.u32 24, %s402_s16 }
   0xd   : > { %224 = vperm.xlu0 %335, %v221_v0  }
   0xe   : > { %s207_s24 = scalar_lea.vmem %s396_s0, %s325_s21  ;;  %s212_s27 = scalar_lea.vmem %s397_s1, %s325_s21 }
   0xf   : > { %v218_v4 = vld [vmem:[%s207_s24] sm:$0xff]  ;;  %v219_v5 = vld [vmem:[%s207_s24 + $0x8] sm:$0xff]  ;;  %v220_v6 = vld [vmem:[%s207_s24 + $0x10] sm:$0xff]  ;;  %s217_s30 = scalar_lea.vmem %s400_s4, %s325_s21 }
  0x10   : > { %v239_v11 = vld [vmem:[%s212_s27] sm:$0xff]  ;;  %v240_v12 = vld [vmem:[%s212_s27 + $0x8] sm:$0xff]  ;;  %v241_v13 = vld [vmem:[%s212_s27 + $0x10] sm:$0xff] }
  0x11   : > { %233 = vperm.xlu0 %335, %v230_v2  }
  0x88   : > { %v225_v3 = vpop.permute.xlu0 %224 }
  0x89   : > { %v227_v7 = vmul.f32 %v225_v3, %v218_v4  ;;  %v228_v8 = vmul.f32 %v225_v3, %v219_v5  ;;  %v229_v9 = vmul.f32 %v225_v3, %v220_v6 }
  0x8c   : > { %v234_v10 = vpop.permute.xlu0 %233 }
  0x8d   : > { %v236_v14 = vadd.f32 %v234_v10, %v227_v7  ;;  %v237_v15 = vadd.f32 %v234_v10, %v228_v8  ;;  %v238_v16 = vadd.f32 %v234_v10, %v229_v9 }
  0x8f   : > { %v242_v17 = vadd.f32 %v239_v11, %v236_v14  ;;  %v243_v18 = vadd.f32 %v240_v12, %v237_v15  ;;  %v244_v19 = vadd.f32 %v241_v13, %v238_v16 }
  0x91   : > { %245 = vst [vmem:[%s217_s30] sm:$0xff] %v242_v17  ;;  %246 = vst [vmem:[%s217_s30 + $0x8] sm:$0xff] %v243_v18 }
  0x92   : > { %247 = vst [vmem:[%s217_s30 + $0x10] sm:$0xff] %v244_v19 }
  0x93 PF: > { %s14_s15 = sadd.s32 1, %s342_s15  }
  0x94   : > { %p11_p4 = scmp.ge.s32.totalorder %s14_s15, 4  }
  0x96   :  { %13 = sbr.rel (!%p11_p4) target bundleno = 1 (0x1), region = 69 }

// kernel: product_unit_residual_block.3
= control target key start
LH: loop header
LB: loop body
LE: loop exit
PB: predicated region body
PF: predicated region fallthrough
CT: control target
= control target key end

     0   :  { %s726_s15 = smov 0   ;;  %s835_s0 = inlined_call_operand.vmem [shape: f32[2,8,640], index: 0, kind: input, shape index: {}]   ;;  %s836_s1 = inlined_call_operand.vmem [shape: f32[8,72], index: 1, kind: input, shape index: {}]   ;;  %s837_s2 = inlined_call_operand.vmem [shape: f32[1,512], index: 2, kind: input, shape index: {}]   ;;  %s838_s3 = inlined_call_operand.vmem [shape: f32[2,8,512], index: 3, kind: output, shape index: {0}]   ;;  %s839_s4 = inlined_call_operand.vmem [shape: f32[2,8,2], index: 4, kind: output, shape index: {1}]  }
   0x1 LB: > { %s652_s16 = sadd.s32 4294967295, %s690_s15   ;;  %p656_p0 = scmp.ge.s32.totalorder %s690_s15, 1  ;;  %s690_s15 = sphi %s726_s15, %s15_s15  }
   0x2   : > { %p165_p1 = scmp.lt.s32.totalorder %s690_s15, 3 }
   0x4   : > { %p166_p2 = pnand %p656_p0, %p165_p1 }
   0x5   : > { %p195_p3 = scmp.lt.s32.totalorder (!%p166_p2), %s652_s16, 1  ;;  %s692_s21 = smov (!%p166_p2), 90  }
   0x6   : > { %169 = sbr.rel (%p166_p2) target bundleno = 552 (0x228), region = 32  ;;  %s693_s22 = smov (!%p166_p2), 91  }
   0x7   : > { %s694_s23 = smov (!%p166_p2), 92   ;;  %s695_s24 = smov (!%p166_p2), 108  }
   0x8   : > { %s696_s25 = smov (!%p166_p2), 109   ;;  %s697_s26 = smov (!%p166_p2), 110  }
   0x9   : > { %s698_s27 = smov (!%p166_p2), 126   ;;  %s699_s28 = smov (!%p166_p2), 127  }
   0xb   : > { %s841_s16 = smov (!%p195_p3, %s652_s16), 1  ;;  %v700_v5 = vmov 0.0   ;;  %vm363_vm0 = vcmask 736256   ;;  %vm344_vm1 = vcmask 744448   ;;  %vm325_vm2 = vcmask 752640  }
   0xc   : > { %s666_s17 = smul.u32 40, %s841_s16  ;;  %440 = vmatprep.mubr.f32.mxu0 %v700_v5  ;;  %511 = vmatprep.mubr.f32.mxu1 %v700_v5  ;;  %vm306_vm3 = vcmask 883712   ;;  %vm287_vm4 = vcmask 891904   ;;  %vm268_vm5 = vcmask 900096   ;;  %vm249_vm6 = vcmask 1031168   ;;  %s665_s5 = sshll.u32 %s841_s16, 5 }
   0xd   : > { %vm230_vm7 = vcmask 1039360   ;;  %vm372_vm8 = vcmask 588800   ;;  %s204_s10 = scalar_lea.vmem %s838_s3, %s665_s5  ;;  %s660_s11 = sshll.u32 %s841_s16, 3  ;;  %vm553_vm9 = vcmask 7168   ;;  %vm564_vm10 = vcmask 15368  }
   0xe   : > { %s199_s20 = scalar_lea.vmem %s835_s0, %s666_s17  ;;  %s208_s14 = scalar_lea.vmem %s839_s4, %s660_s11 }
   0xf   : > { %v740_v0 = vld [vmem:[%s199_s20 + $0x8] sm:$0xff]  ;;  %v742_v1 = vld [vmem:[%s199_s20] sm:$0xff]  ;;  %v746_v2 = vld [vmem:[%s199_s20 + $0x10] sm:$0xff] }
  0x10   : > { %355 = vrot.lane.b32.xlu0 %v740_v0, %s692_s21  ;;  %353 = vrot.lane.b32.xlu1 %v742_v1, %s692_s21  ;;  %v754_v3 = vld [vmem:[%s199_s20 + $0x18] sm:$0xff]  ;;  %v213_v4 = vld [vmem:[%s199_s20 + $0x20] sm:$0xff] }
  0x14   : > { %357 = vrot.lane.b32.xlu0 %v746_v2, %s692_s21  ;;  %336 = vrot.lane.b32.xlu1 %v740_v0, %s693_s22 }
  0x18   : > { %338 = vrot.lane.b32.xlu0 %v746_v2, %s693_s22  ;;  %334 = vrot.lane.b32.xlu1 %v742_v1, %s693_s22 }
  0x1c   : > { %317 = vrot.lane.b32.xlu0 %v740_v0, %s694_s23  ;;  %319 = vrot.lane.b32.xlu1 %v746_v2, %s694_s23 }
  0x20   : > { %359 = vrot.lane.b32.xlu0 %v754_v3, %s692_s21  ;;  %361 = vrot.lane.b32.xlu1 %v213_v4, %s692_s21 }
  0x24   : > { %315 = vrot.lane.b32.xlu0 %v742_v1, %s694_s23  ;;  %298 = vrot.lane.b32.xlu1 %v740_v0, %s695_s24 }
  0x28   : > { %300 = vrot.lane.b32.xlu0 %v746_v2, %s695_s24  ;;  %340 = vrot.lane.b32.xlu1 %v754_v3, %s693_s22 }
  0x2c   : > { %342 = vrot.lane.b32.xlu0 %v213_v4, %s693_s22  ;;  %296 = vrot.lane.b32.xlu1 %v742_v1, %s695_s24 }
  0x30   : > { %279 = vrot.lane.b32.xlu0 %v740_v0, %s696_s25  ;;  %281 = vrot.lane.b32.xlu1 %v746_v2, %s696_s25 }
  0x34   : > { %321 = vrot.lane.b32.xlu0 %v754_v3, %s694_s23  ;;  %323 = vrot.lane.b32.xlu1 %v213_v4, %s694_s23 }
  0x38   : > { %277 = vrot.lane.b32.xlu0 %v742_v1, %s696_s25  ;;  %260 = vrot.lane.b32.xlu1 %v740_v0, %s697_s26 }
  0x3c   : > { %262 = vrot.lane.b32.xlu0 %v746_v2, %s697_s26  ;;  %302 = vrot.lane.b32.xlu1 %v754_v3, %s695_s24 }
  0x40   : > { %304 = vrot.lane.b32.xlu0 %v213_v4, %s695_s24  ;;  %258 = vrot.lane.b32.xlu1 %v742_v1, %s697_s26 }
  0x44   : > { %241 = vrot.lane.b32.xlu0 %v740_v0, %s698_s27  ;;  %243 = vrot.lane.b32.xlu1 %v746_v2, %s698_s27 }
  0x48   : > { %283 = vrot.lane.b32.xlu0 %v754_v3, %s696_s25  ;;  %285 = vrot.lane.b32.xlu1 %v213_v4, %s696_s25 }
  0x4c   : > { %239 = vrot.lane.b32.xlu0 %v742_v1, %s698_s27  ;;  %222 = vrot.lane.b32.xlu1 %v740_v0, %s699_s28 }
  0x50   : > { %224 = vrot.lane.b32.xlu0 %v746_v2, %s699_s28  ;;  %264 = vrot.lane.b32.xlu1 %v754_v3, %s697_s26 }
  0x54   : > { %266 = vrot.lane.b32.xlu0 %v213_v4, %s697_s26  ;;  %220 = vrot.lane.b32.xlu1 %v742_v1, %s699_s28 }
  0x58   : > { %245 = vrot.lane.b32.xlu0 %v754_v3, %s698_s27  ;;  %247 = vrot.lane.b32.xlu1 %v213_v4, %s698_s27 }
  0x5c   : > { %226 = vrot.lane.b32.xlu0 %v754_v3, %s699_s28  ;;  %228 = vrot.lane.b32.xlu1 %v213_v4, %s699_s28 }
  0x82   : > { %v356_v6 = vpop.permute.xlu0 %355  ;;  %v354_v7 = vpop.permute.xlu1 %353 }
  0x83   : > { %v364_v11 = vsel %vm363_vm0, %v354_v7, %v356_v6 }
  0x86   : > { %v358_v8 = vpop.permute.xlu0 %357  ;;  %v337_v9 = vpop.permute.xlu1 %336 }
  0x87   : > { %v365_v10 = vsel %vm363_vm0, %v356_v6, %v358_v8 }
  0x88   : > { %390 = vmatprep.subr.mxu0 %v365_v10  ;;  %v214_v10 = vld [vmem:[%s836_s1] sm:$0xff] }
  0x89   : > { %391 = vmatpush1.msra.mxu0 %v364_v11 }
  0x8a   : > { %v339_v12 = vpop.permute.xlu0 %338  ;;  %v335_v13 = vpop.permute.xlu1 %334 }
  0x8b   : > { %v346_v14 = vsel %vm344_vm1, %v337_v9, %v339_v12  ;;  %v345_v15 = vsel %vm344_vm1, %v335_v13, %v337_v9 }
  0x8c   : > { %392 = vmatprep.subr.mxu0 %v346_v14 }
  0x8d   : > { %393 = vmatpush1.msra.mxu0 %v345_v15 }
  0x8e   : > { %v318_v16 = vpop.permute.xlu0 %317  ;;  %v320_v17 = vpop.permute.xlu1 %319 }
  0x8f   : > { %v327_v18 = vsel %vm325_vm2, %v318_v16, %v320_v17 }
  0x90   : > { %394 = vmatprep.subr.mxu0 %v327_v18 }
  0x92   : > { %v360_v19 = vpop.permute.xlu0 %359  ;;  %v362_v20 = vpop.permute.xlu1 %361 }
  0x93   : > { %v367_v21 = vsel %vm363_vm0, %v360_v19, %v362_v20  ;;  %v366_v22 = vsel %vm363_vm0, %v358_v8, %v360_v19 }
  0x94   : > { %461 = vmatprep.subr.mxu1 %v367_v21  ;;  %v522_v21 = vld [vmem:[%s837_s2] sm:$0xf] }
  0x95   : > { %462 = vmatpush1.msra.mxu1 %v366_v22 }
  0x96   : > { %v316_v23 = vpop.permute.xlu0 %315  ;;  %v299_v24 = vpop.permute.xlu1 %298 }
  0x97   : > { %v326_v25 = vsel %vm325_vm2, %v316_v23, %v318_v16 }
  0x98   : > { %395 = vmatpush1.msra.mxu0 %v326_v25 }
  0x9a   : > { %v301_v26 = vpop.permute.xlu0 %300  ;;  %v341_v27 = vpop.permute.xlu1 %340 }
  0x9b   : > { %v308_v28 = vsel %vm306_vm3, %v299_v24, %v301_v26  ;;  %v347_v33 = vsel %vm344_vm1, %v339_v12, %v341_v27 }
  0x9c   : > { %396 = vmatprep.subr.mxu0 %v308_v28 }
  0x9e   : > { %v343_v29 = vpop.permute.xlu0 %342  ;;  %v297_v30 = vpop.permute.xlu1 %296 }
  0x9f   : > { %v307_v31 = vsel %vm306_vm3, %v297_v30, %v299_v24  ;;  %v348_v32 = vsel %vm344_vm1, %v341_v27, %v343_v29 }
  0xa0   : > { %397 = vmatpush1.msra.mxu0 %v307_v31  ;;  %463 = vmatprep.subr.mxu1 %v348_v32 }
  0xa1   : > { %464 = vmatpush1.msra.mxu1 %v347_v33 }
  0xa2   : > { %v280_v34 = vpop.permute.xlu0 %279  ;;  %v282_v35 = vpop.permute.xlu1 %281 }
  0xa3   : > { %v289_v36 = vsel %vm287_vm4, %v280_v34, %v282_v35 }
  0xa4   : > { %398 = vmatprep.subr.mxu0 %v289_v36 }
  0xa6   : > { %v322_v37 = vpop.permute.xlu0 %321  ;;  %v324_v38 = vpop.permute.xlu1 %323 }
  0xa7   : > { %v329_v39 = vsel %vm325_vm2, %v322_v37, %v324_v38  ;;  %v328_v40 = vsel %vm325_vm2, %v320_v17, %v322_v37 }
  0xa8   : > { %465 = vmatprep.subr.mxu1 %v329_v39 }
  0xa9   : > { %466 = vmatpush1.msra.mxu1 %v328_v40 }
  0xaa   : > { %v278_v41 = vpop.permute.xlu0 %277  ;;  %v261_v42 = vpop.permute.xlu1 %260 }
  0xab   : > { %v288_v43 = vsel %vm287_vm4, %v278_v41, %v280_v34 }
  0xac   : > { %399 = vmatpush1.msra.mxu0 %v288_v43 }
  0xae   : > { %v263_v44 = vpop.permute.xlu0 %262  ;;  %v303_v45 = vpop.permute.xlu1 %302 }
  0xaf   : > { %v270_v46 = vsel %vm268_vm5, %v261_v42, %v263_v44  ;;  %v309_v51 = vsel %vm306_vm3, %v301_v26, %v303_v45 }
  0xb0   : > { %400 = vmatprep.subr.mxu0 %v270_v46 }
  0xb2   : > { %v305_v47 = vpop.permute.xlu0 %304  ;;  %v259_v48 = vpop.permute.xlu1 %258 }
  0xb3   : > { %v269_v49 = vsel %vm268_vm5, %v259_v48, %v261_v42  ;;  %v310_v50 = vsel %vm306_vm3, %v303_v45, %v305_v47 }
  0xb4   : > { %401 = vmatpush1.msra.mxu0 %v269_v49  ;;  %467 = vmatprep.subr.mxu1 %v310_v50 }
  0xb5   : > { %468 = vmatpush1.msra.mxu1 %v309_v51 }
  0xb6   : > { %v242_v52 = vpop.permute.xlu0 %241  ;;  %v244_v53 = vpop.permute.xlu1 %243 }
  0xb7   : > { %v251_v54 = vsel %vm249_vm6, %v242_v52, %v244_v53 }
  0xb8   : > { %402 = vmatprep.subr.mxu0 %v251_v54 }
  0xba   : > { %v284_v55 = vpop.permute.xlu0 %283  ;;  %v286_v56 = vpop.permute.xlu1 %285 }
  0xbb   : > { %v291_v57 = vsel %vm287_vm4, %v284_v55, %v286_v56  ;;  %v290_v58 = vsel %vm287_vm4, %v282_v35, %v284_v55 }
  0xbc   : > { %469 = vmatprep.subr.mxu1 %v291_v57 }
  0xbd   : > { %470 = vmatpush1.msra.mxu1 %v290_v58 }
  0xbe   : > { %v240_v59 = vpop.permute.xlu0 %239  ;;  %v223_v60 = vpop.permute.xlu1 %222 }
  0xbf   : > { %v250_v61 = vsel %vm249_vm6, %v240_v59, %v242_v52 }
  0xc0   : > { %403 = vmatpush1.msra.mxu0 %v250_v61 }
  0xc2   : > { %v225_v62 = vpop.permute.xlu0 %224  ;;  %v265_v63 = vpop.permute.xlu1 %264 }
  0xc3   : > { %v232_v4 = vsel %vm230_vm7, %v223_v60, %v225_v62  ;;  %v271_v9 = vsel %vm268_vm5, %v263_v44, %v265_v63 }
  0xc4   : > { %404 = vmatprep.subr.mxu0 %v232_v4 }
  0xc6   : > { %v267_v5 = vpop.permute.xlu0 %266  ;;  %v221_v6 = vpop.permute.xlu1 %220 }
  0xc7   : > { %v231_v7 = vsel %vm230_vm7, %v221_v6, %v223_v60  ;;  %v272_v8 = vsel %vm268_vm5, %v265_v63, %v267_v5 }
  0xc8   : > { %405 = vmatpush1.msra.mxu0 %v231_v7  ;;  %471 = vmatprep.subr.mxu1 %v272_v8 }
  0xc9   : > { %472 = vmatpush1.msra.mxu1 %v271_v9  ;;  %406 = vmatprep.subr.mxu0 %v740_v0  ;;  %v524_v0 = vlaneseq }
  0xca   : > { %v246_v11 = vpop.permute.xlu0 %245  ;;  %v248_v12 = vpop.permute.xlu1 %247  ;;  %407 = vmatpush1.msra.mxu0 %v742_v1 }
  0xcb   : > { %v253_v13 = vsel %vm249_vm6, %v246_v11, %v248_v12  ;;  %v252_v14 = vsel %vm249_vm6, %v244_v53, %v246_v11  ;;  %661 = vmatmul.mubr.msk.f32.vlgmr.msra.gmra.mxu0 %vm372_vm8, %v214_v10  ;;  %v525_v1 = vshrl.u32 %v524_v0, 7 }
  0xcc   : > { %473 = vmatprep.subr.mxu1 %v253_v13 }
  0xcd   : > { %474 = vmatpush1.msra.mxu1 %v252_v14  ;;  %v526_v19 = vsub.s32 0, %v525_v1  ;;  %v530_v20 = vsub.s32 1, %v525_v1  ;;  %v534_v24 = vsub.s32 2, %v525_v1  ;;  %v538_v27 = vsub.s32 3, %v525_v1 }
  0xce   : > { %v227_v15 = vpop.permute.xlu0 %226  ;;  %v229_v16 = vpop.permute.xlu1 %228 }
  0xcf   : > { %v234_v17 = vsel %vm230_vm7, %v227_v15, %v229_v16  ;;  %v233_v18 = vsel %vm230_vm7, %v225_v62, %v227_v15  ;;  %v527_v23 = vrot.slane %v522_v21, %v526_v19  ;;  %v535_v28 = vrot.slane %v522_v21, %v534_v24 }
  0xd0   : > { %475 = vmatprep.subr.mxu1 %v234_v17  ;;  %v539_v31 = vrot.slane %v522_v21, %v538_v27 }
  0xd1   : > { %476 = vmatpush1.msra.mxu1 %v233_v18 }
  0xd2   : > { %477 = vmatprep.subr.mxu1 %v754_v3  ;;  %v531_v3 = vrot.slane %v522_v21, %v530_v20 }
  0xd3   : > { %478 = vmatpush1.msra.mxu1 %v746_v2 }
  0xd4   : > { %662 = vmatmul.mubr.msk.f32.vlgmr.msra.gmra.mxu1 %vm372_vm8, %v214_v10 }
 0x18b   : > { %v442_v22 = vpop.f32.mrf.mxu0 }
 0x18c   : > { %518 = vst [vmem:[%s204_s10] sm:$0xff] %v442_v22  ;;  %v544_v25 = vmul.f32 %v527_v23, %v442_v22 }
 0x18d   : > { %v444_v2 = vpop.f32.mrf.mxu0 }
 0x18e   : > { %519 = vst [vmem:[%s204_s10 + $0x8] sm:$0xff] %v444_v2  ;;  %v545_v26 = vmul.f32 %v531_v3, %v444_v2  ;;  %v555_v29 = vmul.f32 %v544_v25, %v544_v25 }
 0x190   : > { %v556_v30 = vmul.f32 %v545_v26, %v545_v26  ;;  %v548_v33 = vadd.f32 %v545_v26, %v544_v25 }
 0x192   : > { %v559_v36 = vadd.f32 %v556_v30, %v555_v29 }
 0x194   : > { %v513_v32 = vpop.f32.mrf.mxu1 }
 0x195   : > { %520 = vst [vmem:[%s204_s10 + $0x10] sm:$0xff] %v513_v32  ;;  %v546_v34 = vmul.f32 %v535_v28, %v513_v32 }
 0x196   : > { %v515_v35 = vpop.f32.mrf.mxu1 }
 0x197   : > { %v557_v37 = vmul.f32 %v546_v34, %v546_v34  ;;  %521 = vst [vmem:[%s204_s10 + $0x18] sm:$0xff] %v515_v35  ;;  %v547_v38 = vmul.f32 %v539_v31, %v515_v35  ;;  %v549_v39 = vadd.f32 %v548_v33, %v546_v34 }
 0x199   : > { %v558_v40 = vmul.f32 %v547_v38, %v547_v38  ;;  %v550_v41 = vadd.f32 %v549_v39, %v547_v38  ;;  %v560_v42 = vadd.f32 %v559_v36, %v557_v37 }
 0x19b   : > { %551 = vadd.xlane.f32.xlu0 %v550_v41  ;;  %v561_v43 = vadd.f32 %v560_v42, %v558_v40 }
 0x19d   : > { %562 = vadd.xlane.f32.xlu1 %v561_v43 }
 0x224   : > { %v552_v44 = vpop.xlane.xlu0 %551 }
 0x225   : > { %554 = vst.msk [vmem:[%s208_s14] sm:$0xff] %vm553_vm9, %v552_v44 }
 0x226   : > { %v563_v45 = vpop.xlane.xlu1 %562 }
 0x227   : > { %565 = vst.msk [vmem:[%s208_s14] sm:$0xff] %vm564_vm10, %v563_v45 }
 0x228 PF: > { %s15_s15 = sadd.s32 1, %s690_s15  }
 0x229   : > { %p12_p4 = scmp.ge.s32.totalorder %s15_s15, 4  }
 0x22b   :  { %14 = sbr.rel (!%p12_p4) target bundleno = 1 (0x1), region = 74 }

// kernel: product_unit_residual_block.4
= control target key start
LH: loop header
LB: loop body
LE: loop exit
PB: predicated region body
PF: predicated region fallthrough
CT: control target
= control target key end

     0   :  { %s940_s29 = smov 0   ;;  %s1066_s0 = inlined_call_operand.vmem [shape: f32[2,8,512], index: 0, kind: input, shape index: {}]   ;;  %s1067_s1 = inlined_call_operand.vmem [shape: f32[8,72], index: 1, kind: input, shape index: {}]   ;;  %s1068_s2 = inlined_call_operand.vmem [shape: f32[8,1], index: 2, kind: input, shape index: {}]   ;;  %s1069_s3 = inlined_call_operand.vmem [shape: f32[8,1], index: 3, kind: input, shape index: {}]   ;;  %s1070_s4 = inlined_call_operand.<no memory space> [shape: f32[1,1], index: 4, kind: input, shape index: {}]   ;;  %s1071_s5 = inlined_call_operand.vmem [shape: f32[1,512], index: 5, kind: input, shape index: {}]   ;;  %s1072_s6 = inlined_call_operand.vmem [shape: f32[1,384], index: 6, kind: input, shape index: {}]   ;;  %s1073_s7 = inlined_call_operand.vmem [shape: f32[2,8,384], index: 7, kind: output, shape index: {0}]   ;;  %s1074_s8 = inlined_call_operand.vmem [shape: f32[2,8,2], index: 8, kind: output, shape index: {1}]  }
   0x1   :  { %v14_v0 = vstv %s1070_s4 }
   0x2   :  { %15 = vst [vmem:[#allocation2] sm:$0x1] %v14_v0 }
   0x3 LB: > { %s791_s30 = sadd.s32 4294967295, %s879_s29   ;;  %p795_p0 = scmp.ge.s32.totalorder %s879_s29, 1  ;;  %s879_s29 = sphi %s940_s29, %s21_s29  }
   0x4   : > { %p267_p1 = scmp.lt.s32.totalorder %s879_s29, 3 }
   0x6   : > { %p268_p2 = pnand %p795_p0, %p267_p1 }
   0x7   : > { %p305_p3 = scmp.lt.s32.totalorder (!%p268_p2), %s791_s30, 1  ;;  %s882_s18 = smov (!%p268_p2), 90  }
   0x8   : > { %271 = sbr.rel (%p268_p2) target bundleno = 701 (0x2bd), region = 48  ;;  %s884_s19 = smov (!%p268_p2), 91  }
   0x9   : > { %s885_s20 = smov (!%p268_p2), 92   ;;  %s886_s21 = smov (!%p268_p2), 108  }
   0xa   : > { %s887_s22 = smov (!%p268_p2), 109   ;;  %s888_s23 = smov (!%p268_p2), 110  }
   0xb   : > { %s889_s24 = smov (!%p268_p2), 126   ;;  %s890_s25 = smov (!%p268_p2), 127  }
   0xd   : > { %v323_v1 = vld [vmem:[%s1068_s2] sm:$0xff]  ;;  %v881_v3 = vmov 0   ;;  %s1076_s30 = smov (!%p305_p3, %s791_s30), 1  ;;  %v367_v21 = vlaneseq  ;;  %v883_v42 = vmov 0.0   ;;  %vm891_vm0 = vmmov 0  }
   0xe   : > { %v800_v2 = vld [vmem:[#allocation2] ss:$0 sm:$0xff]  ;;  %857 = vset.pattern.permute.xlu0 %v881_v3  ;;  %858 = vset.pattern.permute.xlu1 %v881_v3  ;;  %s805_s12 = sshll.u32 %s1076_s30, 5  ;;  %vm509_vm1 = vcmask 736256   ;;  %vm494_vm2 = vcmask 744448   ;;  %vm479_vm3 = vcmask 752640  }
   0xf   : > { %326 = vperm.xlu0 %857, %v323_v1   ;;  %351 = vperm.xlu1 %858, %v800_v2   ;;  %v333_v4 = vld [vmem:[%s1069_s3] sm:$0xff]  ;;  %s309_s15 = scalar_lea.vmem %s1066_s0, %s805_s12  ;;  %v960_v23 = vshrl.u32 %v367_v21, 7  ;;  %vm464_vm4 = vcmask 883712   ;;  %vm449_vm5 = vcmask 891904   ;;  %vm434_vm6 = vcmask 900096   ;;  %s837_s28 = smul.u32 24, %s1076_s30 }
  0x10   : > { %v319_v6 = vld [vmem:[%s309_s15] sm:$0xff]  ;;  %v320_v7 = vld [vmem:[%s309_s15 + $0x8] sm:$0xff]  ;;  %v321_v8 = vld [vmem:[%s309_s15 + $0x10] sm:$0xff]  ;;  %816 = vmatprep.subr.mxu1 %v883_v42  ;;  %584 = vmatprep.mubr.f32.mxu0 %v883_v42  ;;  %vm419_vm7 = vcmask 1031168   ;;  %vm404_vm8 = vcmask 1039360   ;;  %vm516_vm9 = vcmask 588800  }
  0x11   : > { %v322_v20 = vld [vmem:[%s309_s15 + $0x18] sm:$0xff]  ;;  %v373_v25 = vsub.s32 1, %v960_v23  ;;  %v343_v26 = vld [vmem:[%s1071_s5] sm:$0xf]  ;;  %v377_v27 = vsub.s32 2, %v960_v23  ;;  %v369_v30 = vsub.s32 0, %v960_v23  ;;  %834 = vmatprep.mubr.msk.f32.mxu1 %vm891_vm0, %v883_v42  ;;  %s314_s12 = scalar_lea.vmem %s1073_s7, %s837_s28 }
  0x12   : > { %v381_v43 = vsub.s32 3, %v960_v23  ;;  %s799_s13 = sshll.u32 %s1076_s30, 3  ;;  %vm694_vm10 = vcmask 7168   ;;  %vm703_vm11 = vcmask 15368  }
  0x13   : > { %336 = vperm.xlu0 %857, %v333_v4   ;;  %v374_v31 = vrot.slane %v343_v26, %v373_v25  ;;  %v378_v33 = vrot.slane %v343_v26, %v377_v27  ;;  %v370_v37 = vrot.slane %v343_v26, %v369_v30  ;;  %s318_s16 = scalar_lea.vmem %s1074_s8, %s799_s13 }
  0x14   : > { %v382_v45 = vrot.slane %v343_v26, %v381_v43 }
  0x8a   : > { %v327_v5 = vpop.permute.xlu0 %326  ;;  %v352_v13 = vpop.permute.xlu1 %351 }
  0x8b   : > { %v329_v9 = vmul.f32 %v327_v5, %v319_v6  ;;  %v330_v10 = vmul.f32 %v327_v5, %v320_v7  ;;  %v331_v11 = vmul.f32 %v327_v5, %v321_v8  ;;  %v332_v22 = vmul.f32 %v327_v5, %v322_v20 }
  0x8e   : > { %v337_v12 = vpop.permute.xlu0 %336 }
  0x8f   : > { %v339_v14 = vadd.f32 %v337_v12, %v329_v9  ;;  %v340_v15 = vadd.f32 %v337_v12, %v330_v10  ;;  %v341_v16 = vadd.f32 %v337_v12, %v331_v11  ;;  %v342_v24 = vadd.f32 %v337_v12, %v332_v22 }
  0x91   : > { %v354_v17 = vmax.f32 %v339_v14, %v352_v13  ;;  %v355_v18 = vmax.f32 %v340_v15, %v352_v13  ;;  %v356_v19 = vmax.f32 %v341_v16, %v352_v13  ;;  %v357_v28 = vmax.f32 %v342_v24, %v352_v13 }
  0x93   : > { %859 = vlog2.f32 %v354_v17 }
  0x94   : > { %861 = vlog2.f32 %v355_v18 }
  0x95   : > { %863 = vlog2.f32 %v356_v19 }
  0x96   : > { %865 = vlog2.f32 %v357_v28 }
  0xa0   : > { %v860_v29 = vpop.eup %859 }
  0xa1   : > { %v862_v32 = vpop.eup %861  ;;  %v359_v38 = vmul.f32 0.6931472, %v860_v29 }
  0xa2   : > { %v864_v34 = vpop.eup %863  ;;  %v361_v35 = vmul.f32 0.6931472, %v862_v32 }
  0xa3   : > { %v363_v36 = vmul.f32 0.6931472, %v864_v34  ;;  %v980_v41 = vmul.f32 %v370_v37, %v359_v38  ;;  %v866_v44 = vpop.eup %865 }
  0xa4   : > { %v974_v39 = vmul.f32 %v374_v31, %v361_v35  ;;  %v365_v46 = vmul.f32 0.6931472, %v866_v44  ;;  %v391_v44 = vld [vmem:[%s1067_s1] sm:$0xff] }
  0xa5   : > { %v976_v40 = vmul.f32 %v378_v33, %v363_v36 }
  0xa6   : > { %503 = vrot.lane.b32.xlu1 %v974_v39, %s882_s18  ;;  %v390_v47 = vmul.f32 %v382_v45, %v365_v46 }
  0xa7   : > { %505 = vrot.lane.b32.xlu0 %v976_v40, %s882_s18 }
  0xaa   : > { %501 = vrot.lane.b32.xlu1 %v980_v41, %s882_s18 }
  0xab   : > { %488 = vrot.lane.b32.xlu0 %v974_v39, %s884_s19 }
  0xae   : > { %490 = vrot.lane.b32.xlu1 %v976_v40, %s884_s19 }
  0xaf   : > { %486 = vrot.lane.b32.xlu0 %v980_v41, %s884_s19 }
  0xb2   : > { %473 = vrot.lane.b32.xlu1 %v974_v39, %s885_s20 }
  0xb3   : > { %475 = vrot.lane.b32.xlu0 %v976_v40, %s885_s20 }
  0xb6   : > { %471 = vrot.lane.b32.xlu1 %v980_v41, %s885_s20 }
  0xb7   : > { %507 = vrot.lane.b32.xlu0 %v390_v47, %s882_s18 }
  0xba   : > { %458 = vrot.lane.b32.xlu1 %v974_v39, %s886_s21 }
  0xbb   : > { %460 = vrot.lane.b32.xlu0 %v976_v40, %s886_s21 }
  0xbe   : > { %456 = vrot.lane.b32.xlu1 %v980_v41, %s886_s21 }
  0xbf   : > { %492 = vrot.lane.b32.xlu0 %v390_v47, %s884_s19 }
  0xc2   : > { %443 = vrot.lane.b32.xlu1 %v974_v39, %s887_s22 }
  0xc3   : > { %445 = vrot.lane.b32.xlu0 %v976_v40, %s887_s22 }
  0xc6   : > { %441 = vrot.lane.b32.xlu1 %v980_v41, %s887_s22 }
  0xc7   : > { %477 = vrot.lane.b32.xlu0 %v390_v47, %s885_s20 }
  0xca   : > { %428 = vrot.lane.b32.xlu1 %v974_v39, %s888_s23 }
  0xcb   : > { %430 = vrot.lane.b32.xlu0 %v976_v40, %s888_s23 }
  0xce   : > { %426 = vrot.lane.b32.xlu1 %v980_v41, %s888_s23 }
  0xcf   : > { %462 = vrot.lane.b32.xlu0 %v390_v47, %s886_s21 }
  0xd2   : > { %413 = vrot.lane.b32.xlu1 %v974_v39, %s889_s24 }
  0xd3   : > { %415 = vrot.lane.b32.xlu0 %v976_v40, %s889_s24 }
  0xd6   : > { %411 = vrot.lane.b32.xlu1 %v980_v41, %s889_s24 }
  0xd7   : > { %447 = vrot.lane.b32.xlu0 %v390_v47, %s887_s22 }
  0xda   : > { %398 = vrot.lane.b32.xlu1 %v974_v39, %s890_s25 }
  0xdb   : > { %400 = vrot.lane.b32.xlu0 %v976_v40, %s890_s25 }
  0xde   : > { %396 = vrot.lane.b32.xlu1 %v980_v41, %s890_s25 }
  0xdf   : > { %432 = vrot.lane.b32.xlu0 %v390_v47, %s888_s23 }
  0xe2   : > { %417 = vrot.lane.b32.xlu1 %v390_v47, %s889_s24 }
  0xe3   : > { %402 = vrot.lane.b32.xlu0 %v390_v47, %s890_s25 }
 0x118   : > { %v504_v48 = vpop.permute.xlu1 %503 }
 0x119   : > { %v506_v49 = vpop.permute.xlu0 %505 }
 0x11a   : > { %v511_v50 = vsel %vm509_vm1, %v504_v48, %v506_v49 }
 0x11b   : > { %534 = vmatprep.subr.mxu0 %v511_v50 }
 0x11c   : > { %v502_v51 = vpop.permute.xlu1 %501 }
 0x11d   : > { %v489_v52 = vpop.permute.xlu0 %488  ;;  %v510_v53 = vsel %vm509_vm1, %v502_v51, %v504_v48 }
 0x11e   : > { %535 = vmatpush1.msra.mxu0 %v510_v53 }
 0x120   : > { %v491_v54 = vpop.permute.xlu1 %490 }
 0x121   : > { %v487_v55 = vpop.permute.xlu0 %486  ;;  %v496_v56 = vsel %vm494_vm2, %v489_v52, %v491_v54 }
 0x122   : > { %536 = vmatprep.subr.mxu0 %v496_v56  ;;  %v495_v57 = vsel %vm494_vm2, %v487_v55, %v489_v52 }
 0x123   : > { %537 = vmatpush1.msra.mxu0 %v495_v57 }
 0x124   : > { %v474_v58 = vpop.permute.xlu1 %473 }
 0x125   : > { %v476_v59 = vpop.permute.xlu0 %475 }
 0x126   : > { %v481_v60 = vsel %vm479_vm3, %v474_v58, %v476_v59 }
 0x127   : > { %538 = vmatprep.subr.mxu0 %v481_v60 }
 0x128   : > { %v472_v61 = vpop.permute.xlu1 %471 }
 0x129   : > { %v508_v62 = vpop.permute.xlu0 %507  ;;  %v480_v63 = vsel %vm479_vm3, %v472_v61, %v474_v58 }
 0x12a   : > { %539 = vmatpush1.msra.mxu0 %v480_v63  ;;  %v512_v0 = vsel %vm509_vm1, %v506_v49, %v508_v62 }
 0x12b   : > { %817 = vmatpush3.msra.mxu1 %v512_v0 }
 0x12c   : > { %v459_v1 = vpop.permute.xlu1 %458  ;;  %818 = vmatprep.subr.mxu1 %v883_v42 }
 0x12d   : > { %v461_v2 = vpop.permute.xlu0 %460 }
 0x12e   : > { %v466_v3 = vsel %vm464_vm4, %v459_v1, %v461_v2 }
 0x12f   : > { %540 = vmatprep.subr.mxu0 %v466_v3 }
 0x130   : > { %v457_v4 = vpop.permute.xlu1 %456 }
 0x131   : > { %v493_v5 = vpop.permute.xlu0 %492  ;;  %v465_v6 = vsel %vm464_vm4, %v457_v4, %v459_v1 }
 0x132   : > { %541 = vmatpush1.msra.mxu0 %v465_v6  ;;  %v497_v7 = vsel %vm494_vm2, %v491_v54, %v493_v5  ;;  %v670_v54 = vld [vmem:[%s1072_s6] sm:$0x7] }
 0x133   : > { %819 = vmatpush3.msra.mxu1 %v497_v7  ;;  %v683_v58 = vrot.slane %v670_v54, %v377_v27 }
 0x134   : > { %v444_v8 = vpop.permute.xlu1 %443  ;;  %820 = vmatprep.subr.mxu1 %v883_v42 }
 0x135   : > { %v446_v9 = vpop.permute.xlu0 %445 }
 0x136   : > { %v451_v10 = vsel %vm449_vm5, %v444_v8, %v446_v9 }
 0x137   : > { %542 = vmatprep.subr.mxu0 %v451_v10 }
 0x138   : > { %v442_v11 = vpop.permute.xlu1 %441 }
 0x139   : > { %v478_v12 = vpop.permute.xlu0 %477  ;;  %v450_v13 = vsel %vm449_vm5, %v442_v11, %v444_v8 }
 0x13a   : > { %543 = vmatpush1.msra.mxu0 %v450_v13  ;;  %v482_v14 = vsel %vm479_vm3, %v476_v59, %v478_v12 }
 0x13b   : > { %821 = vmatpush3.msra.mxu1 %v482_v14 }
 0x13c   : > { %v429_v15 = vpop.permute.xlu1 %428  ;;  %822 = vmatprep.subr.mxu1 %v883_v42 }
 0x13d   : > { %v431_v16 = vpop.permute.xlu0 %430 }
 0x13e   : > { %v436_v17 = vsel %vm434_vm6, %v429_v15, %v431_v16 }
 0x13f   : > { %544 = vmatprep.subr.mxu0 %v436_v17 }
 0x140   : > { %v427_v18 = vpop.permute.xlu1 %426 }
 0x141   : > { %v463_v19 = vpop.permute.xlu0 %462  ;;  %v435_v20 = vsel %vm434_vm6, %v427_v18, %v429_v15 }
 0x142   : > { %545 = vmatpush1.msra.mxu0 %v435_v20  ;;  %v467_v21 = vsel %vm464_vm4, %v461_v2, %v463_v19 }
 0x143   : > { %823 = vmatpush3.msra.mxu1 %v467_v21 }
 0x144   : > { %v414_v22 = vpop.permute.xlu1 %413  ;;  %824 = vmatprep.subr.mxu1 %v883_v42 }
 0x145   : > { %v416_v24 = vpop.permute.xlu0 %415 }
 0x146   : > { %v421_v26 = vsel %vm419_vm7, %v414_v22, %v416_v24 }
 0x147   : > { %546 = vmatprep.subr.mxu0 %v421_v26 }
 0x148   : > { %v412_v28 = vpop.permute.xlu1 %411 }
 0x149   : > { %v448_v29 = vpop.permute.xlu0 %447  ;;  %v420_v31 = vsel %vm419_vm7, %v412_v28, %v414_v22 }
 0x14a   : > { %547 = vmatpush1.msra.mxu0 %v420_v31  ;;  %v452_v32 = vsel %vm449_vm5, %v446_v9, %v448_v29 }
 0x14b   : > { %825 = vmatpush3.msra.mxu1 %v452_v32 }
 0x14c   : > { %v399_v33 = vpop.permute.xlu1 %398  ;;  %826 = vmatprep.subr.mxu1 %v883_v42 }
 0x14d   : > { %v401_v34 = vpop.permute.xlu0 %400 }
 0x14e   : > { %v406_v35 = vsel %vm404_vm8, %v399_v33, %v401_v34 }
 0x14f   : > { %548 = vmatprep.subr.mxu0 %v406_v35 }
 0x150   : > { %v397_v36 = vpop.permute.xlu1 %396 }
 0x151   : > { %v433_v37 = vpop.permute.xlu0 %432  ;;  %v405_v38 = vsel %vm404_vm8, %v397_v36, %v399_v33 }
 0x152   : > { %549 = vmatpush1.msra.mxu0 %v405_v38  ;;  %v437_v43 = vsel %vm434_vm6, %v431_v16, %v433_v37 }
 0x153   : > { %827 = vmatpush3.msra.mxu1 %v437_v43  ;;  %550 = vmatprep.subr.mxu0 %v974_v39 }
 0x154   : > { %551 = vmatpush1.msra.mxu0 %v980_v41  ;;  %v418_v45 = vpop.permute.xlu1 %417  ;;  %828 = vmatprep.subr.mxu1 %v883_v42 }
 0x155   : > { %v403_v46 = vpop.permute.xlu0 %402  ;;  %801 = vmatmul.mubr.msk.f32.vlgmr.msra.gmra.mxu0 %vm516_vm9, %v391_v44  ;;  %v422_v47 = vsel %vm419_vm7, %v416_v24, %v418_v45 }
 0x156   : > { %829 = vmatpush3.msra.mxu1 %v422_v47  ;;  %v407_v48 = vsel %vm404_vm8, %v401_v34, %v403_v46 }
 0x157   : > { %830 = vmatprep.subr.mxu1 %v883_v42 }
 0x158   : > { %831 = vmatpush3.msra.mxu1 %v407_v48 }
 0x159   : > { %832 = vmatprep.subr.mxu1 %v883_v42  ;;  %v675_v42 = vrot.slane %v670_v54, %v369_v30 }
 0x15a   : > { %833 = vmatpush3.msra.mxu1 %v976_v40  ;;  %v679_v40 = vrot.slane %v670_v54, %v373_v25 }
 0x15b   : > { %835 = vmatmul.mubr.msk.f32.vlgmr.msra.gmra.mxu1 %vm516_vm9, %v391_v44 }
 0x215   : > { %v586_v39 = vpop.f32.mrf.mxu0 }
 0x216   : > { %v661_v41 = vmul.f32 1.442695, %v586_v39 }
 0x217   : > { %v588_v49 = vpop.f32.mrf.mxu0 }
 0x218   : > { %867 = vpow2.f32 %v661_v41  ;;  %v663_v50 = vmul.f32 1.442695, %v588_v49 }
 0x21a   : > { %869 = vpow2.f32 %v663_v50 }
 0x21b   : > { %v657_v51 = vpop.f32.mrf.mxu1 }
 0x21c   : > { %v665_v52 = vmul.f32 1.442695, %v657_v51 }
 0x21d   : > { %v836_v53 = vpop.f32.mrf.mxu1 }
 0x21e   : > { %871 = vpow2.f32 %v665_v52 }
 0x225   : > { %v868_v55 = vpop.eup %867 }
 0x226   : > { %667 = vst [vmem:[%s314_s12] sm:$0xff] %v868_v55  ;;  %v687_v56 = vmul.f32 %v868_v55, %v675_v42 }
 0x227   : > { %v870_v57 = vpop.eup %869 }
 0x228   : > { %668 = vst [vmem:[%s314_s12 + $0x8] sm:$0xff] %v870_v57  ;;  %v688_v59 = vmul.f32 %v870_v57, %v679_v40  ;;  %v696_v60 = vmul.f32 %v687_v56, %v687_v56 }
 0x22a   : > { %v697_v61 = vmul.f32 %v688_v59, %v688_v59  ;;  %v690_v63 = vadd.f32 %v688_v59, %v687_v56 }
 0x22b   : > { %v872_v30 = vpop.eup %871 }
 0x22c   : > { %669 = vst [vmem:[%s314_s12 + $0x10] sm:$0xff] %v872_v30  ;;  %v689_v62 = vmul.f32 %v872_v30, %v683_v58  ;;  %v699_v2 = vadd.f32 %v697_v61, %v696_v60 }
 0x22e   : > { %v691_v0 = vadd.f32 %v690_v63, %v689_v62  ;;  %v698_v1 = vmul.f32 %v689_v62, %v689_v62 }
 0x230   : > { %692 = vadd.xlane.f32.xlu1 %v691_v0  ;;  %v700_v25 = vadd.f32 %v699_v2, %v698_v1 }
 0x232   : > { %701 = vadd.xlane.f32.xlu0 %v700_v25 }
 0x2b9   : > { %v693_v23 = vpop.xlane.xlu1 %692 }
 0x2ba   : > { %695 = vst.msk [vmem:[%s318_s16] sm:$0xff] %vm694_vm10, %v693_v23 }
 0x2bb   : > { %v702_v27 = vpop.xlane.xlu0 %701 }
 0x2bc   : > { %704 = vst.msk [vmem:[%s318_s16] sm:$0xff] %vm703_vm11, %v702_v27 }
 0x2bd PF: > { %s21_s29 = sadd.s32 1, %s879_s29  }
 0x2be   : > { %p18_p4 = scmp.ge.s32.totalorder %s21_s29, 4  }
 0x2c0   :  { %20 = sbr.rel (!%p18_p4) target bundleno = 3 (0x3), region = 90 }

</bundles_post_ra>
